<compile_context>
chip_gen: v7x
topology: tpu7x:2x2x1
jax: 0.10.0
libtpu: 0.0.40
codegen_flags: <defaults>
</compile_context>

<pallas_src>
import functools

import jax
import jax.numpy as jnp
from jax.experimental import pallas as pl
from jax.experimental.pallas import tpu as pltpu

_SQRT_HALF = 0.7071067811865476        # 1 / sqrt(2)
_SQRT_2_OVER_PI = 0.7978845608028654   # sqrt(2 / pi)  (tanh-approx GELU)
_LN_EPS = 1e-5                         # PyTorch LayerNorm default eps
_HIGHEST = jax.lax.Precision.HIGHEST   # fp32 contract precision on the MXU


def _feature_encoder_kernel(x_ref, w1_ref, w2_ref, avg_ref, p_ref, o_ref, *,
                            approximate_gelu: bool):
    """One packed row tile: linear1 -> GELU -> LayerNorm -> dropout(eval) -> linear2.

    The row tile packs `pack` original rows per kernel row (lane segments of D);
    W1/W2/avg are block-diagonal so each segment stays independent.
    p_ref packs the four (pack*D,) parameter vectors as rows of one (4, pack*D) tile:
      row 0 = b1, row 1 = gamma, row 2 = beta, row 3 = b2.
    """
    b1 = p_ref[0:1, :]
    gamma = p_ref[1:2, :]
    beta = p_ref[2:3, :]
    b2 = p_ref[3:4, :]

    # ---- linear1 (block-diagonal packed): (tm, pack*L) @ (pack*L, pack*D) + bias ----
    h = jnp.dot(x_ref[...], w1_ref[...],
                preferred_element_type=jnp.float32, precision=_HIGHEST) + b1

    # ---- GELU ----
    if approximate_gelu:
        # tanh approximation -> EUP slot (frees the VALU); ~1e-3 vs exact erf.
        h = 0.5 * h * (1.0 + jnp.tanh(_SQRT_2_OVER_PI * (h + 0.044715 * h * h * h)))
    else:
        # exact erf-based GELU, matches torch.nn.GELU() default
        h = 0.5 * h * (1.0 + jax.lax.erf(h * _SQRT_HALF))

    # ---- LayerNorm over each D-lane segment (eps = 1e-5), f32 math ----
    # avg_ref is block-diagonal ones(D,D)/D: h @ avg broadcasts each segment's mean
    # across that segment, keeping the packed lane-dense layout (no XLU relayouts).
    mean = jnp.dot(h, avg_ref[...],
                   preferred_element_type=jnp.float32, precision=_HIGHEST)
    centered = h - mean
    var = jnp.dot(centered * centered, avg_ref[...],
                  preferred_element_type=jnp.float32, precision=_HIGHEST)
    h = centered * jax.lax.rsqrt(var + _LN_EPS) * gamma + beta

    # ---- dropout: identity in eval mode ----
    # TODO(synk): training-mode dropout (p=0.15) via pltpu.prng_seed/prng_random_bits
    # with per-tile seeding.

    # ---- linear2 (block-diagonal packed): (tm, pack*D) @ (pack*D, pack*D) + bias ----
    out = jnp.dot(h, w2_ref[...],
                  preferred_element_type=jnp.float32, precision=_HIGHEST) + b2
    o_ref[...] = out.astype(o_ref.dtype)


def _round_up(x: int, m: int) -> int:
    return ((x + m - 1) // m) * m


def _block_diag(blocks):
    """Block-diagonal stack of equally shaped 2-D blocks (wrapper-side, traced once)."""
    n = len(blocks)
    a, b = blocks[0].shape
    out = jnp.zeros((n * a, n * b), blocks[0].dtype)
    for i, blk in enumerate(blocks):
        out = out.at[i * a:(i + 1) * a, i * b:(i + 1) * b].set(blk)
    return out


def _choose_tile(mq: int, target: int):
    """Pick (row_tile, padded_rows) for the packed row dimension.

    - Small problems: one grid step (no forced split whose overhead exceeds the work).
    - Large problems: prefer an exact multiple-of-8 divisor of mq near the target so
      no jnp.pad / out[:M] HBM round-trips are needed; otherwise fall back to padding.
    """
    if mq <= target:
        return mq, mq
    if mq % 8 == 0:
        t = target
        while t >= 8 and mq % t != 0:
            t -= 8
        if t >= max(8, target // 8):
            return t, mq
    return target, _round_up(mq, target)


@functools.partial(jax.jit, static_argnames=("tm", "approximate_gelu"))
def feature_encoder(x, w1, b1, gamma, beta, w2, b2, *, tm=4096, approximate_gelu=False):
    """x: (M, L) float32. Returns (M, D) float32.

    `tm` is the target row tile in *original* rows.  Rows are packed `pack` at a time
    along lanes (pack = 128 // D) so the hidden dimension fills full 128-lane vregs.
    """
    M, L = x.shape
    D = w1.shape[1]

    # Lane-packing factor: D=32 -> pack=4 -> 128-lane-dense hidden/output tiles.
    pack = 128 // D if (D <= 128 and 128 % D == 0) else 1
    LP, DP = pack * L, pack * D

    # --- choose the packed row tile -------------------------------------------
    target = max(8, _round_up(max(1, tm // pack), 8))
    mq = pl.cdiv(M, pack)                       # packed rows needed
    tm_pack, mq_pad = _choose_tile(mq, target)
    rows_pad = mq_pad * pack

    if rows_pad != M:
        x = jnp.pad(x, ((0, rows_pad - M), (0, 0)))
    xp = x.reshape(mq_pad, LP)                  # row-major reshape: free

    # --- block-diagonal packed weights + fused parameter tile ------------------
    w1p = _block_diag([w1] * pack)                                   # (pack*L, pack*D)
    w2p = _block_diag([w2] * pack)                                   # (pack*D, pack*D)
    avg = _block_diag([jnp.full((D, D), 1.0 / D, jnp.float32)] * pack)  # LN averaging
    params = jnp.stack([jnp.tile(b1, pack), jnp.tile(gamma, pack),
                        jnp.tile(beta, pack), jnp.tile(b2, pack)], axis=0)  # (4, pack*D)

    const = lambda i: (0, 0)
    grid_m = mq_pad // tm_pack

    out = pl.pallas_call(
        functools.partial(_feature_encoder_kernel, approximate_gelu=approximate_gelu),
        out_shape=jax.ShapeDtypeStruct((mq_pad, DP), jnp.float32),
        grid_spec=pltpu.PrefetchScalarGridSpec(
            num_scalar_prefetch=0,
            grid=(grid_m,),
            in_specs=[
                pl.BlockSpec((tm_pack, LP), lambda i: (i, 0)),  # packed x row tile
                pl.BlockSpec((LP, DP), const),                  # block-diag W1 (resident)
                pl.BlockSpec((DP, DP), const),                  # block-diag W2 (resident)
                pl.BlockSpec((DP, DP), const),                  # block-diag LN averaging matrix
                pl.BlockSpec((4, DP), const),                   # fused b1/gamma/beta/b2
            ],
            out_specs=pl.BlockSpec((tm_pack, DP), lambda i: (i, 0)),
        ),
        compiler_params=pltpu.CompilerParams(
            dimension_semantics=("parallel",)),
    )(xp, w1p, w2p, avg, params)

    out = out.reshape(rows_pad, D)              # row-major unpack: free
    if rows_pad != M:
        out = out[:M]
    return out


def _reference(x, w1, b1, gamma, beta, w2, b2, approximate_gelu=False):
    """Pure-JAX reference with the module's exact semantics (f32 matmuls, biased LN)."""
    h = jnp.dot(x, w1, precision=_HIGHEST) + b1
    if approximate_gelu:
        h = 0.5 * h * (1.0 + jnp.tanh(_SQRT_2_OVER_PI * (h + 0.044715 * h ** 3)))
    else:
        h = 0.5 * h * (1.0 + jax.lax.erf(h * _SQRT_HALF))
    mean = jnp.mean(h, axis=-1, keepdims=True)
    var = jnp.mean((h - mean) ** 2, axis=-1, keepdims=True)
    h = (h - mean) * jax.lax.rsqrt(var + _LN_EPS) * gamma + beta
    return jnp.dot(h, w2, precision=_HIGHEST) + b2


if __name__ == "__main__":
    # Small shapes consistent with the module:
    #   structured_length (L) = 16, n_embd (D) = 32, batch = 2, seq = 8.
    B, S, L, D = 2, 8, 16, 32
    key = jax.random.PRNGKey(0)
    k_x, k_w1, k_b1, k_w2, k_b2, k_big = jax.random.split(key, 6)

    structured = jax.random.normal(k_x, (B, S, L), dtype=jnp.float32)

    # Deterministic parameter init (synthetic, not a checkpoint).
    w1 = jax.random.normal(k_w1, (L, D), dtype=jnp.float32) * 0.05
    b1 = jax.random.normal(k_b1, (D,), dtype=jnp.float32) * 0.05
    gamma = jnp.ones((D,), dtype=jnp.float32)
    beta = jnp.zeros((D,), dtype=jnp.float32)
    w2 = jax.random.normal(k_w2, (D, D), dtype=jnp.float32) * 0.05
    b2 = jax.random.normal(k_b2, (D,), dtype=jnp.float32) * 0.05

    x2d = structured.reshape(B * S, L)   # rows = (batch, seq) flattened

    # 1) Default path: M=16 -> 4 packed rows, single grid step.
    out2d = feature_encoder(x2d, w1, b1, gamma, beta, w2, b2)
    jax.block_until_ready(out2d)
    ref2d = _reference(x2d, w1, b1, gamma, beta, w2, b2)
    assert jnp.allclose(out2d, ref2d, atol=2e-5, rtol=2e-5), "mismatch vs reference"
    out = out2d.reshape(B, S, D)
    jax.block_until_ready(out)

    # 2) Ragged M path: M=14 (not a multiple of the 4x packing) -> zero-pad + slice.
    x_odd = x2d[:14]
    out_odd = feature_encoder(x_odd, w1, b1, gamma, beta, w2, b2)
    jax.block_until_ready(out_odd)
    ref_odd = _reference(x_odd, w1, b1, gamma, beta, w2, b2)
    assert jnp.allclose(out_odd, ref_odd, atol=2e-5, rtol=2e-5), "mismatch (ragged path)"

    # 3) Multi-step grid path: M=2048, tm=512 -> packed rows 512, divisor tile 128,
    #    grid of 4 parallel steps, no padding copies.
    x_big = jax.random.normal(k_big, (2048, L), dtype=jnp.float32)
    out_big = feature_encoder(x_big, w1, b1, gamma, beta, w2, b2, tm=512)
    jax.block_until_ready(out_big)
    ref_big = _reference(x_big, w1, b1, gamma, beta, w2, b2)
    assert jnp.allclose(out_big, ref_big, atol=2e-5, rtol=2e-5), "mismatch (grid path)"

    # 4) Optional tanh-approx GELU path (EUP) vs a matching tanh reference.
    out_apx = feature_encoder(x2d, w1, b1, gamma, beta, w2, b2, approximate_gelu=True)
    jax.block_until_ready(out_apx)
    ref_apx = _reference(x2d, w1, b1, gamma, beta, w2, b2, approximate_gelu=True)
    assert jnp.allclose(out_apx, ref_apx, atol=2e-5, rtol=2e-5), "mismatch (approx GELU)"

    print("KERNEL_OK")
</pallas_src>

<mosaic_0001>
module attributes {stable_mosaic.version = 11 : i64} {
  func.func @_feature_encoder_kernel(%arg0: i32, %arg1: memref<4x64xf32, #tpu.memory_space<vmem>>, %arg2: memref<64x128xf32, #tpu.memory_space<vmem>>, %arg3: memref<128x128xf32, #tpu.memory_space<vmem>>, %arg4: memref<128x128xf32, #tpu.memory_space<vmem>>, %arg5: memref<4x128xf32, #tpu.memory_space<vmem>>, %arg6: memref<4x128xf32, #tpu.memory_space<vmem>>) attributes {dimension_semantics = [#tpu.dimension_semantics<parallel>], iteration_bounds = array<i64: 1>, scalar_prefetch = 0 : i64, scratch_operands = 0 : i64, tpu.core_type = #tpu.core_type<tc>, window_params = [{transform_indices = @transform_0, window_bounds = array<i64: 4, 64>}, {pipeline_mode = #tpu.pipeline_mode<synchronous>, transform_indices = @transform_1, window_bounds = array<i64: 64, 128>}, {pipeline_mode = #tpu.pipeline_mode<synchronous>, transform_indices = @transform_2, window_bounds = array<i64: 128, 128>}, {pipeline_mode = #tpu.pipeline_mode<synchronous>, transform_indices = @transform_3, window_bounds = array<i64: 128, 128>}, {pipeline_mode = #tpu.pipeline_mode<synchronous>, transform_indices = @transform_4, window_bounds = array<i64: 4, 128>}, {transform_indices = @transform_5, window_bounds = array<i64: 4, 128>}]} {
    %c0 = arith.constant 0 : index
    %c0_0 = arith.constant 0 : index
    %0 = vector.load %arg5[%c0, %c0_0] : memref<4x128xf32, #tpu.memory_space<vmem>>, vector<1x128xf32>
    %c1 = arith.constant 1 : index
    %c0_1 = arith.constant 0 : index
    %1 = vector.load %arg5[%c1, %c0_1] : memref<4x128xf32, #tpu.memory_space<vmem>>, vector<1x128xf32>
    %c2 = arith.constant 2 : index
    %c0_2 = arith.constant 0 : index
    %2 = vector.load %arg5[%c2, %c0_2] : memref<4x128xf32, #tpu.memory_space<vmem>>, vector<1x128xf32>
    %c3 = arith.constant 3 : index
    %c0_3 = arith.constant 0 : index
    %3 = vector.load %arg5[%c3, %c0_3] : memref<4x128xf32, #tpu.memory_space<vmem>>, vector<1x128xf32>
    %c0_4 = arith.constant 0 : index
    %c0_5 = arith.constant 0 : index
    %4 = vector.load %arg1[%c0_4, %c0_5] : memref<4x64xf32, #tpu.memory_space<vmem>>, vector<4x64xf32>
    %c0_6 = arith.constant 0 : index
    %c0_7 = arith.constant 0 : index
    %5 = vector.load %arg2[%c0_6, %c0_7] : memref<64x128xf32, #tpu.memory_space<vmem>>, vector<64x128xf32>
    %cst = arith.constant dense<0.000000e+00> : vector<4x128xf32>
    %6 = tpu.matmul %4, %5, %cst {dimension_numbers = #tpu.dot_dimension_numbers<[1], [0], [0], [1], [0, 0, 1, 1], [], []>, precision = #tpu.contract_precision<fp32>} : vector<4x64xf32>, vector<64x128xf32>, vector<4x128xf32> -> vector<4x128xf32>
    %7 = vector.broadcast %0 : vector<1x128xf32> to vector<4x128xf32>
    %8 = arith.addf %6, %7 : vector<4x128xf32>
    %cst_8 = arith.constant 5.000000e-01 : f32
    %9 = vector.broadcast %cst_8 : f32 to vector<4x128xf32>
    %10 = arith.mulf %9, %8 : vector<4x128xf32>
    %cst_9 = arith.constant 0.707106769 : f32
    %11 = vector.broadcast %cst_9 : f32 to vector<4x128xf32>
    %12 = arith.mulf %8, %11 : vector<4x128xf32>
    %13 = math.erf %12 : vector<4x128xf32>
    %cst_10 = arith.constant 1.000000e+00 : f32
    %14 = vector.broadcast %cst_10 : f32 to vector<4x128xf32>
    %15 = arith.addf %14, %13 : vector<4x128xf32>
    %16 = arith.mulf %10, %15 : vector<4x128xf32>
    %c0_11 = arith.constant 0 : index
    %c0_12 = arith.constant 0 : index
    %17 = vector.load %arg4[%c0_11, %c0_12] : memref<128x128xf32, #tpu.memory_space<vmem>>, vector<128x128xf32>
    %cst_13 = arith.constant dense<0.000000e+00> : vector<4x128xf32>
    %18 = tpu.matmul %16, %17, %cst_13 {dimension_numbers = #tpu.dot_dimension_numbers<[1], [0], [0], [1], [0, 0, 1, 1], [], []>, precision = #tpu.contract_precision<fp32>} : vector<4x128xf32>, vector<128x128xf32>, vector<4x128xf32> -> vector<4x128xf32>
    %19 = arith.subf %16, %18 : vector<4x128xf32>
    %20 = arith.mulf %19, %19 : vector<4x128xf32>
    %c0_14 = arith.constant 0 : index
    %c0_15 = arith.constant 0 : index
    %21 = vector.load %arg4[%c0_14, %c0_15] : memref<128x128xf32, #tpu.memory_space<vmem>>, vector<128x128xf32>
    %cst_16 = arith.constant dense<0.000000e+00> : vector<4x128xf32>
    %22 = tpu.matmul %20, %21, %cst_16 {dimension_numbers = #tpu.dot_dimension_numbers<[1], [0], [0], [1], [0, 0, 1, 1], [], []>, precision = #tpu.contract_precision<fp32>} : vector<4x128xf32>, vector<128x128xf32>, vector<4x128xf32> -> vector<4x128xf32>
    %cst_17 = arith.constant 9.99999974E-6 : f32
    %23 = vector.broadcast %cst_17 : f32 to vector<4x128xf32>
    %24 = arith.addf %22, %23 : vector<4x128xf32>
    %25 = math.rsqrt %24 : vector<4x128xf32>
    %26 = arith.mulf %19, %25 : vector<4x128xf32>
    %27 = vector.broadcast %1 : vector<1x128xf32> to vector<4x128xf32>
    %28 = arith.mulf %26, %27 : vector<4x128xf32>
    %29 = vector.broadcast %2 : vector<1x128xf32> to vector<4x128xf32>
    %30 = arith.addf %28, %29 : vector<4x128xf32>
    %c0_18 = arith.constant 0 : index
    %c0_19 = arith.constant 0 : index
    %31 = vector.load %arg3[%c0_18, %c0_19] : memref<128x128xf32, #tpu.memory_space<vmem>>, vector<128x128xf32>
    %cst_20 = arith.constant dense<0.000000e+00> : vector<4x128xf32>
    %32 = tpu.matmul %30, %31, %cst_20 {dimension_numbers = #tpu.dot_dimension_numbers<[1], [0], [0], [1], [0, 0, 1, 1], [], []>, precision = #tpu.contract_precision<fp32>} : vector<4x128xf32>, vector<128x128xf32>, vector<4x128xf32> -> vector<4x128xf32>
    %33 = vector.broadcast %3 : vector<1x128xf32> to vector<4x128xf32>
    %34 = arith.addf %32, %33 : vector<4x128xf32>
    %c0_21 = arith.constant 0 : index
    %c0_22 = arith.constant 0 : index
    %35 = vector.load %arg6[%c0_21, %c0_22] : memref<4x128xf32, #tpu.memory_space<vmem>>, vector<4x128xf32>
    tpu.vector_store %arg6[%c0_21, %c0_22], %34 {strides = array<i32>} : memref<4x128xf32, #tpu.memory_space<vmem>>, vector<4x128xf32>,
    return
  }
  func.func @transform_0(%arg0: i32) -> (i32, i32) {
    %c0_i32 = arith.constant 0 : i32
    %c0_i32_0 = arith.constant 0 : i32
    return %arg0, %c0_i32 : i32, i32
  }
  func.func @transform_1(%arg0: i32) -> (i32, i32) {
    %c0_i32 = arith.constant 0 : i32
    %c0_i32_0 = arith.constant 0 : i32
    %c0_i32_1 = arith.constant 0 : i32
    return %c0_i32, %c0_i32_0 : i32, i32
  }
  func.func @transform_2(%arg0: i32) -> (i32, i32) {
    %c0_i32 = arith.constant 0 : i32
    %c0_i32_0 = arith.constant 0 : i32
    %c0_i32_1 = arith.constant 0 : i32
    return %c0_i32, %c0_i32_0 : i32, i32
  }
  func.func @transform_3(%arg0: i32) -> (i32, i32) {
    %c0_i32 = arith.constant 0 : i32
    %c0_i32_0 = arith.constant 0 : i32
    %c0_i32_1 = arith.constant 0 : i32
    return %c0_i32, %c0_i32_0 : i32, i32
  }
  func.func @transform_4(%arg0: i32) -> (i32, i32) {
    %c0_i32 = arith.constant 0 : i32
    %c0_i32_0 = arith.constant 0 : i32
    %c0_i32_1 = arith.constant 0 : i32
    return %c0_i32, %c0_i32_0 : i32, i32
  }
  func.func @transform_5(%arg0: i32) -> (i32, i32) {
    %c0_i32 = arith.constant 0 : i32
    %c0_i32_0 = arith.constant 0 : i32
    return %arg0, %c0_i32 : i32, i32
  }
}

</mosaic_0001>

<bundles_post_ra>
// kernel: tile.23
= control target key start
LH: loop header
LB: loop body
LE: loop exit
PB: predicated region body
PF: predicated region fallthrough
CT: control target
= control target key end

     0   :  { %s22_s0 = inlined_call_operand.vmem [shape: f32[32], index: 0, kind: input, shape index: {}]   ;;  %s23_s1 = inlined_call_operand.vmem [shape: f32[4,32], index: 1, kind: output, shape index: {}]  }
   0x1   :  { %v4_v0 = vld [vmem:[%s22_s0] ss:$0 sm:$0xff] }
   0x2   :  { %5 = vst [vmem:[%s23_s1] sm:$0xf] %v4_v0 }

// kernel: tile.36
= control target key start
LH: loop header
LB: loop body
LE: loop exit
PB: predicated region body
PF: predicated region fallthrough
CT: control target
= control target key end

     0   :  { %vm7_vm0 = vcmask 261120   ;;  %s37_s8 = smov 32   ;;  %s38_s9 = smov 64   ;;  %vm13_vm1 = vcmask 1048320   ;;  %vm19_vm2 = vcmask 785920   ;;  %vm25_vm3 = vcmask 523520   ;;  %s55_s0 = inlined_call_operand.vmem [shape: f32[4,32], index: 0, kind: input, shape index: {}]   ;;  %s56_s1 = inlined_call_operand.vmem [shape: f32[1,128], index: 1, kind: output, shape index: {}]  }
   0x1   :  { %v4_v0 = vld [vmem:[%s55_s0] sm:$0xf]  ;;  %s36_s0 = smov 96  }
   0x2   :  { %5 = vst [vmem:[#allocation1] sm:$0xf] %v4_v0 }
   0x9   :  { %v10_v1 = vld [vmem:[#allocation1 + $0x3] sm:$0x1]   ;;  %v22_v2 = vld [vmem:[#allocation1 + $0x1] sm:$0x1]   ;;  %v6_v3 = vld [vmem:[#allocation1] sm:$0x1]  }
   0xa   :  { %11 = vrot.lane.b32.xlu0 %v10_v1, %s36_s0  ;;  %23 = vrot.lane.b32.xlu1 %v22_v2, %s37_s8  ;;  %v16_v4 = vld [vmem:[#allocation1 + $0x2] sm:$0x1]   ;;  %8 = vst.msk [vmem:[#allocation0] sm:$0x1] %vm7_vm0, %v6_v3  }
   0xe   :  { %17 = vrot.lane.b32.xlu0 %v16_v4, %s38_s9 }
  0x7c   :  { %v12_v5 = vpop.permute.xlu0 %11   ;;  %v24_v6 = vpop.permute.xlu1 %23  }
  0x7d   :  { %14 = vst.msk [vmem:[#allocation0] sm:$0x1] %vm13_vm1, %v12_v5  }
  0x80   :  { %v18_v7 = vpop.permute.xlu0 %17  }
  0x81   :  { %20 = vst.msk [vmem:[#allocation0] sm:$0x1] %vm19_vm2, %v18_v7  }
  0x82   :  { %26 = vst.msk [vmem:[#allocation0] sm:$0x1] %vm25_vm3, %v24_v6  }
  0x89   :  { %v30_v8 = vld [vmem:[#allocation0] sm:$0x1] }
  0x8a   :  { %32 = vst [vmem:[%s56_s1] sm:$0x1] %v30_v8 }

// kernel: feature_encoder.1
= control target key start
LH: loop header
LB: loop body
LE: loop exit
PB: predicated region body
PF: predicated region fallthrough
CT: control target
= control target key end

     0   :  { %v4222_v0 = vmov 0.0|0.0   ;;  %vm4223_vm0 = vmmov 0   ;;  %v4224_v4 = vmov 0.0   ;;  %vm37_vm1 = vcmask 523264   ;;  %s5263_s1 = inlined_call_operand.vmem [shape: f32[64,128], index: 1, kind: input, shape index: {}]   ;;  %s5264_s0 = inlined_call_operand.vmem [shape: f32[4,64], index: 0, kind: input, shape index: {}]   ;;  %s5265_s3 = inlined_call_operand.vmem [shape: f32[128,128], index: 3, kind: input, shape index: {}]   ;;  %s5266_s4 = inlined_call_operand.vmem [shape: f32[4,128], index: 4, kind: input, shape index: {}]   ;;  %s5267_s2 = inlined_call_operand.vmem [shape: f32[128,128], index: 2, kind: input, shape index: {}]   ;;  %s5268_s5 = inlined_call_operand.vmem [shape: f32[4,128], index: 5, kind: output, shape index: {}]  }
   0x1   :  { %3669 = vmatprep.subr.bf16.mxu0 %v4222_v0  ;;  %v25_v1 = vld [vmem:[%s5263_s1] sm:$0xff]  ;;  %v26_v2 = vld [vmem:[%s5263_s1 + $0x8] sm:$0xff]  ;;  %v27_v3 = vld [vmem:[%s5263_s1 + $0x10] sm:$0xff]  ;;  %2941 = vmatprep.mubr.msk.f32.mxu0 %vm4223_vm0, %v4224_v4 }
   0x2   :  { %v42_v5 = vand.u32 4294901760, %v25_v1  ;;  %v45_v6 = vand.u32 4294901760, %v26_v2  ;;  %v28_v7 = vld [vmem:[%s5263_s1 + $0x18] sm:$0xff]  ;;  %v48_v8 = vand.u32 4294901760, %v27_v3  ;;  %v29_v9 = vld [vmem:[%s5263_s1 + $0x20] sm:$0xff]  ;;  %v30_v10 = vld [vmem:[%s5263_s1 + $0x28] sm:$0xff]  ;;  %3765 = vmatprep.subr.bf16.mxu1 %v4222_v0  ;;  %3106 = vmatprep.mubr.msk.f32.mxu1 %vm4223_vm0, %v4224_v4 }
   0x3   :  { %v51_v11 = vand.u32 4294901760, %v28_v7  ;;  %v54_v12 = vand.u32 4294901760, %v29_v9  ;;  %v57_v13 = vand.u32 4294901760, %v30_v10  ;;  %v31_v14 = vld [vmem:[%s5263_s1 + $0x30] sm:$0xff]  ;;  %v24_v19 = vld [vmem:[%s5264_s0] sm:$0xf] }
   0x4   :  { %v4282_v15 = vpack.c.bf16 %v45_v6, %v42_v5  ;;  %v4284_v16 = vsub.f32 %v25_v1, %v42_v5  ;;  %v4286_v17 = vsub.f32 %v26_v2, %v45_v6  ;;  %v4288_v18 = vsub.f32 %v27_v3, %v48_v8  ;;  %v32_v26 = vld [vmem:[%s5263_s1 + $0x38] sm:$0xff]  ;;  %v583_v51 = vld [vmem:[%s5265_s3] sm:$0xff]  ;;  %v584_v52 = vld [vmem:[%s5265_s3 + $0x8] sm:$0xff] }
   0x5   :  { %v4293_v20 = vpack.c.bf16 %v51_v11, %v48_v8  ;;  %v4295_v21 = vsub.f32 %v28_v7, %v51_v11  ;;  %v4298_v22 = vsub.f32 %v29_v9, %v54_v12  ;;  %v4300_v23 = vsub.f32 %v30_v10, %v57_v13  ;;  %v585_v55 = vld [vmem:[%s5265_s3 + $0x10] sm:$0xff]  ;;  %v586_v56 = vld [vmem:[%s5265_s3 + $0x18] sm:$0xff]  ;;  %v587_v57 = vld [vmem:[%s5265_s3 + $0x20] sm:$0xff] }
   0x6   :  { %3671 = vmatpush3.bf16.msra.mxu0 %v4282_v15  ;;  %v60_v24 = vand.u32 4294901760, %v31_v14  ;;  %v39_v25 = vsel %vm37_vm1, %v24_v19, 0  ;;  %v127_v28 = vand.u32 4294901760, %v4284_v16  ;;  %v134_v29 = vand.u32 4294901760, %v4286_v17  ;;  %v588_v60 = vld [vmem:[%s5265_s3 + $0x28] sm:$0xff] }
   0x7   :  { %3672 = vmatprep.subr.bf16.mxu0 %v4222_v0  ;;  %v4306_v27 = vand.u32 4294901760, %v39_v25  ;;  %v141_v30 = vand.u32 4294901760, %v4288_v18  ;;  %v148_v32 = vand.u32 4294901760, %v4295_v21  ;;  %v4327_v37 = vpack.c.bf16 %v57_v13, %v54_v12 }
   0x8   :  { %v4311_v31 = vsub.f32 %v31_v14, %v60_v24  ;;  %v128_v34 = vsub.f32 %v4284_v16, %v127_v28  ;;  %v135_v35 = vsub.f32 %v4286_v17, %v134_v29  ;;  %v63_v38 = vand.u32 4294901760, %v32_v26 }
   0x9   :  { %v4315_v33 = vsub.f32 %v39_v25, %v4306_v27  ;;  %v142_v36 = vsub.f32 %v4288_v18, %v141_v30  ;;  %v149_v39 = vsub.f32 %v4295_v21, %v148_v32  ;;  %v155_v41 = vand.u32 4294901760, %v4298_v22 }
   0xa   :  { %3674 = vmatpush3.bf16.msra.mxu0 %v4293_v20  ;;  %v162_v42 = vand.u32 4294901760, %v4300_v23  ;;  %v129_v43 = vand.u32 4294901760, %v128_v34  ;;  %v136_v44 = vand.u32 4294901760, %v135_v35  ;;  %v169_v45 = vand.u32 4294901760, %v4311_v31 }
   0xb   :  { %3675 = vmatprep.subr.bf16.mxu0 %v4222_v0  ;;  %v116_v40 = vand.u32 4294901760, %v4315_v33  ;;  %v4337_v46 = vsub.f32 %v32_v26, %v63_v38  ;;  %v143_v48 = vand.u32 4294901760, %v142_v36  ;;  %v150_v49 = vand.u32 4294901760, %v149_v39 }
   0xc   :  { %v4343_v50 = vpack.c.bf16 %v63_v38, %v60_v24  ;;  %v156_v53 = vsub.f32 %v4298_v22, %v155_v41  ;;  %v163_v54 = vsub.f32 %v4300_v23, %v162_v42  ;;  %v3682_v58 = vpack.c.bf16 %v136_v44, %v129_v43 }
   0xd   :  { %v117_v47 = vsub.f32 %v4315_v33, %v116_v40  ;;  %v170_v59 = vsub.f32 %v4311_v31, %v169_v45  ;;  %v3685_v62 = vpack.c.bf16 %v150_v49, %v143_v48  ;;  %v176_v63 = vand.u32 4294901760, %v4337_v46 }
   0xe   :  { %3677 = vmatpush3.bf16.msra.mxu0 %v4327_v37  ;;  %v600_v1 = vand.u32 4294901760, %v583_v51  ;;  %v603_v2 = vand.u32 4294901760, %v584_v52  ;;  %v606_v3 = vand.u32 4294901760, %v585_v55  ;;  %v609_v5 = vand.u32 4294901760, %v586_v56 }
   0xf   :  { %3678 = vmatprep.subr.bf16.mxu0 %v4222_v0  ;;  %v118_v61 = vand.u32 4294901760, %v117_v47  ;;  %v612_v6 = vand.u32 4294901760, %v587_v57  ;;  %v157_v7 = vand.u32 4294901760, %v156_v53  ;;  %v164_v8 = vand.u32 4294901760, %v163_v54 }
  0x10   :  { %v4376_v9 = vsub.f32 %v583_v51, %v600_v1  ;;  %v615_v10 = vand.u32 4294901760, %v588_v60  ;;  %v4378_v11 = vpack.c.bf16 %v603_v2, %v600_v1  ;;  %v4380_v12 = vsub.f32 %v584_v52, %v603_v2 }
  0x11   :  { %v4382_v13 = vpack.c.bf16 %v609_v5, %v606_v3  ;;  %v4384_v14 = vsub.f32 %v585_v55, %v606_v3  ;;  %v4387_v24 = vsub.f32 %v586_v56, %v609_v5  ;;  %v4391_v26 = vsub.f32 %v587_v57, %v612_v6 }
  0x12   :  { %3680 = vmatpush3.bf16.msra.mxu0 %v4343_v50  ;;  %v693_v19 = vand.u32 4294901760, %v4376_v9  ;;  %v4389_v25 = vpack.c.bf16 %v615_v10, %v612_v6  ;;  %v177_v34 = vsub.f32 %v4337_v46, %v176_v63  ;;  %v700_v35 = vand.u32 4294901760, %v4380_v12 }
  0x13   :  { %3681 = vmatprep.subr.bf16.mxu0 %v4222_v0  ;;  %v707_v36 = vand.u32 4294901760, %v4384_v14  ;;  %v4400_v38 = vsub.f32 %v588_v60, %v615_v10  ;;  %v714_v43 = vand.u32 4294901760, %v4387_v24  ;;  %v721_v44 = vand.u32 4294901760, %v4391_v26 }
  0x14   :  { %v694_v39 = vsub.f32 %v4376_v9, %v693_v19  ;;  %v701_v47 = vsub.f32 %v4380_v12, %v700_v35  ;;  %v171_v51 = vand.u32 4294901760, %v170_v59  ;;  %v3688_v54 = vpack.c.bf16 %v164_v8, %v157_v7 }
  0x15   :  { %2942 = vmatmul.mubr.f32.vlgmr.msra.gmra.mrb[0].mxu0 %v118_v61  ;;  %v708_v48 = vsub.f32 %v4384_v14, %v707_v36  ;;  %v728_v49 = vand.u32 4294901760, %v4400_v38  ;;  %v715_v53 = vsub.f32 %v4387_v24, %v714_v43  ;;  %v178_v55 = vand.u32 4294901760, %v177_v34 }
  0x16   :  { %3683 = vmatpush3.bf16.msra.mxu0 %v3682_v58  ;;  %2960 = vmatprep.mubr.msk.f32.mxu0 %vm4223_vm0, %v4224_v4  ;;  %v695_v52 = vand.u32 4294901760, %v694_v39  ;;  %v702_v56 = vand.u32 4294901760, %v701_v47  ;;  %v722_v60 = vsub.f32 %v4391_v26, %v721_v44  ;;  %v3694_v5 = vpack.c.bf16 %v4286_v17, %v4284_v16 }
  0x17   :  { %3684 = vmatprep.subr.bf16.mxu0 %v4222_v0  ;;  %v709_v57 = vand.u32 4294901760, %v708_v48  ;;  %v716_v58 = vand.u32 4294901760, %v715_v53  ;;  %v729_v59 = vsub.f32 %v4400_v38, %v728_v49  ;;  %v3691_v1 = vpack.c.bf16 %v178_v55, %v171_v51 }
  0x18   :  { %v4425_v61 = vpack.c.bf16 %v702_v56, %v695_v52  ;;  %v723_v2 = vand.u32 4294901760, %v722_v60  ;;  %v3697_v7 = vpack.c.bf16 %v4295_v21, %v4288_v18  ;;  %v3700_v8 = vpack.c.bf16 %v4300_v23, %v4298_v22  ;;  %v590_v18 = vld [vmem:[%s5265_s3 + $0x38] sm:$0xff] }
  0x19   :  { %v730_v3 = vand.u32 4294901760, %v729_v59  ;;  %v3703_v10 = vpack.c.bf16 %v4337_v46, %v4311_v31  ;;  %v3718_v34 = vpack.c.bf16 %v134_v29, %v127_v28  ;;  %v3721_v39 = vpack.c.bf16 %v148_v32, %v141_v30  ;;  %v4527_v28 = vld [vmem:[%s5265_s3 + $0x48] sm:$0xff] }
  0x1a   :  { %3686 = vmatpush3.bf16.msra.mxu0 %v3685_v62  ;;  %3767 = vmatpush3.bf16.msra.mxu1 %v4425_v61  ;;  %v4428_v62 = vpack.c.bf16 %v716_v58, %v709_v57  ;;  %v3724_v16 = vpack.c.bf16 %v162_v42, %v155_v41  ;;  %v3727_v17 = vpack.c.bf16 %v176_v63, %v169_v45  ;;  %v621_v21 = vand.u32 4294901760, %v590_v18  ;;  %v4548_v42 = vld [vmem:[%s5265_s3 + $0x50] sm:$0xff]  ;;  %v4553_v45 = vld [vmem:[%s5265_s3 + $0x58] sm:$0xff]  ;;  %v595_v57 = vld [vmem:[%s5265_s3 + $0x60] sm:$0xff] }
  0x1b   :  { %3687 = vmatprep.subr.bf16.mxu0 %v4222_v0  ;;  %3768 = vmatprep.subr.bf16.mxu1 %v4222_v0  ;;  %v4437_v6 = vpack.c.bf16 %v730_v3, %v723_v2  ;;  %v627_v32 = vand.u32 4294901760, %v4527_v28  ;;  %v630_v48 = vand.u32 4294901760, %v4548_v42  ;;  %v633_v51 = vand.u32 4294901760, %v4553_v45  ;;  %v596_v58 = vld [vmem:[%s5265_s3 + $0x68] sm:$0xff] }
  0x1c   :  { %v4517_v23 = vsub.f32 %v590_v18, %v621_v21  ;;  %v639_v2 = vand.u32 4294901760, %v596_v58 }
  0x1d   :  { %v4543_v41 = vsub.f32 %v4527_v28, %v627_v32  ;;  %v4568_v55 = vsub.f32 %v4548_v42, %v630_v48  ;;  %v4571_v56 = vsub.f32 %v4553_v45, %v633_v51 }
  0x1e   :  { %3689 = vmatpush3.bf16.msra.mxu0 %v3688_v54  ;;  %3770 = vmatpush3.bf16.msra.mxu1 %v4428_v62  ;;  %v742_v30 = vand.u32 4294901760, %v4517_v23 }
  0x1f   :  { %3690 = vmatprep.subr.bf16.mxu0 %v4222_v0  ;;  %3771 = vmatprep.subr.bf16.mxu1 %v4222_v0  ;;  %v756_v47 = vand.u32 4294901760, %v4543_v41  ;;  %v763_v3 = vand.u32 4294901760, %v4568_v55 }
  0x21   :  { %v757_v54 = vsub.f32 %v4543_v41, %v756_v47 }
  0x22   :  { %3692 = vmatpush3.bf16.msra.mxu0 %v3691_v1  ;;  %3773 = vmatpush3.bf16.msra.mxu1 %v4437_v6  ;;  %v636_v1 = vand.u32 4294901760, %v595_v57 }
  0x23   :  { %3693 = vmatprep.subr.bf16.mxu0 %v4222_v0  ;;  %3774 = vmatprep.subr.bf16.mxu1 %v4222_v0  ;;  %v758_v59 = vand.u32 4294901760, %v757_v54 }
  0x25   :  { %2961 = vmatmul.mubr.f32.vlgmr.msra.gmra.mrb[0].mxu0 %v4306_v27 }
  0x26   :  { %3695 = vmatpush3.bf16.msra.mxu0 %v3694_v5  ;;  %2979 = vmatprep.mubr.msk.f32.mxu0 %vm4223_vm0, %v4224_v4  ;;  %v770_v5 = vand.u32 4294901760, %v4571_v56 }
  0x27   :  { %3696 = vmatprep.subr.bf16.mxu0 %v4222_v0 }
  0x2a   :  { %3698 = vmatpush3.bf16.msra.mxu0 %v3697_v7 }
  0x2b   :  { %3699 = vmatprep.subr.bf16.mxu0 %v4222_v0 }
  0x2e   :  { %3701 = vmatpush3.bf16.msra.mxu0 %v3700_v8  ;;  %v4585_v8 = vsub.f32 %v595_v57, %v636_v1 }
  0x2f   :  { %3702 = vmatprep.subr.bf16.mxu0 %v4222_v0 }
  0x32   :  { %3704 = vmatpush3.bf16.msra.mxu0 %v3703_v10  ;;  %v4587_v10 = vsub.f32 %v596_v58, %v639_v2 }
  0x33   :  { %3705 = vmatprep.subr.bf16.mxu0 %v4222_v0 }
  0x34   :  { %v784_v18 = vand.u32 4294901760, %v4587_v10 }
  0x35   :  { %2980 = vmatmul.mubr.f32.vlgmr.msra.gmra.mrb[0].mxu0 %v4315_v33 }
  0x36   :  { %3707 = vmatpush3.bf16.msra.mxu0 %v4282_v15  ;;  %2998 = vmatprep.mubr.msk.f32.mxu0 %vm4223_vm0, %v4224_v4  ;;  %v785_v45 = vsub.f32 %v4587_v10, %v784_v18 }
  0x37   :  { %3708 = vmatprep.subr.bf16.mxu0 %v4222_v0 }
  0x38   :  { %v786_v58 = vand.u32 4294901760, %v785_v45 }
  0x3a   :  { %3710 = vmatpush3.bf16.msra.mxu0 %v4293_v20 }
  0x3b   :  { %3711 = vmatprep.subr.bf16.mxu0 %v4222_v0 }
  0x3e   :  { %3713 = vmatpush3.bf16.msra.mxu0 %v4327_v37 }
  0x3f   :  { %3714 = vmatprep.subr.bf16.mxu0 %v4222_v0 }
  0x42   :  { %3716 = vmatpush3.bf16.msra.mxu0 %v4343_v50 }
  0x43   :  { %3717 = vmatprep.subr.bf16.mxu0 %v4222_v0 }
  0x45   :  { %2999 = vmatmul.mubr.f32.vlgmr.msra.gmra.mrb[0].mxu0 %v116_v40 }
  0x46   :  { %3719 = vmatpush3.bf16.msra.mxu0 %v3718_v34  ;;  %3017 = vmatprep.mubr.msk.f32.mxu0 %vm4223_vm0, %v4224_v4  ;;  %v764_v34 = vsub.f32 %v4568_v55, %v763_v3 }
  0x47   :  { %3720 = vmatprep.subr.bf16.mxu0 %v4222_v0 }
  0x4a   :  { %3722 = vmatpush3.bf16.msra.mxu0 %v3721_v39  ;;  %v771_v39 = vsub.f32 %v4571_v56, %v770_v5 }
  0x4b   :  { %3723 = vmatprep.subr.bf16.mxu0 %v4222_v0 }
  0x4e   :  { %3725 = vmatpush3.bf16.msra.mxu0 %v3724_v16  ;;  %v597_v16 = vld [vmem:[%s5265_s3 + $0x70] sm:$0xff] }
  0x4f   :  { %3726 = vmatprep.subr.bf16.mxu0 %v4222_v0 }
  0x52   :  { %3728 = vmatpush3.bf16.msra.mxu0 %v3727_v17  ;;  %v598_v17 = vld [vmem:[%s5265_s3 + $0x78] sm:$0xff] }
  0x53   :  { %3729 = vmatprep.subr.bf16.mxu0 %v4222_v0  ;;  %v645_v28 = vand.u32 4294901760, %v598_v17 }
  0x55   :  { %3018 = vmatmul.mubr.f32.vlgmr.msra.gmra.mrb[0].mxu0 %v4306_v27 }
  0x56   :  { %3731 = vmatpush3.bf16.msra.mxu0 %v4282_v15  ;;  %3036 = vmatprep.mubr.msk.f32.mxu0 %vm4223_vm0, %v4224_v4  ;;  %v589_v15 = vld [vmem:[%s5265_s3 + $0x30] sm:$0xff] }
  0x57   :  { %3732 = vmatprep.subr.bf16.mxu0 %v4222_v0 }
  0x5a   :  { %3734 = vmatpush3.bf16.msra.mxu0 %v4293_v20  ;;  %v618_v20 = vand.u32 4294901760, %v589_v15 }
  0x5b   :  { %3735 = vmatprep.subr.bf16.mxu0 %v4222_v0 }
  0x5c   :  { %v4515_v22 = vsub.f32 %v589_v15, %v618_v20  ;;  %v777_v15 = vand.u32 4294901760, %v4585_v8 }
  0x5e   :  { %3737 = vmatpush3.bf16.msra.mxu0 %v4327_v37  ;;  %v735_v29 = vand.u32 4294901760, %v4515_v22  ;;  %v743_v37 = vsub.f32 %v4517_v23, %v742_v30  ;;  %v778_v42 = vsub.f32 %v4585_v8, %v777_v15 }
  0x5f   :  { %3738 = vmatprep.subr.bf16.mxu0 %v4222_v0 }
  0x60   :  { %v736_v33 = vsub.f32 %v4515_v22, %v735_v29  ;;  %v779_v57 = vand.u32 4294901760, %v778_v42  ;;  %v4643_v42 = vpack.c.bf16 %v639_v2, %v636_v1  ;;  %v4669_v1 = vpack.c.bf16 %v4587_v10, %v4585_v8  ;;  %v1899_v8 = vld [vmem:[%s5267_s2 + $0x20] sm:$0xff]  ;;  %v1900_v10 = vld [vmem:[%s5267_s2 + $0x28] sm:$0xff] }
  0x62   :  { %3740 = vmatpush3.bf16.msra.mxu0 %v4343_v50  ;;  %v737_v46 = vand.u32 4294901760, %v736_v33  ;;  %v744_v50 = vand.u32 4294901760, %v743_v37  ;;  %v765_v33 = vand.u32 4294901760, %v764_v34  ;;  %v772_v37 = vand.u32 4294901760, %v771_v39 }
  0x63   :  { %3741 = vmatprep.subr.bf16.mxu0 %v4222_v0  ;;  %v4625_v34 = vpack.c.bf16 %v786_v58, %v779_v57 }
  0x64   :  { %v4559_v52 = vpack.c.bf16 %v744_v50, %v737_v46  ;;  %v4613_v50 = vsub.f32 %v598_v17, %v645_v28  ;;  %v4617_v54 = vpack.c.bf16 %v772_v37, %v765_v33  ;;  %v4641_v37 = vpack.c.bf16 %v633_v51, %v630_v48 }
  0x65   :  { %3037 = vmatmul.mubr.f32.vlgmr.msra.gmra.mrb[0].mxu0 %v4306_v27  ;;  %v4522_v27 = vld [vmem:[%s5265_s3 + $0x40] sm:$0xff]  ;;  %v4665_v51 = vpack.c.bf16 %v4571_v56, %v4568_v55 }
  0x66   :  { %3743 = vmatpush3.bf16.msra.mxu0 %v4378_v11  ;;  %3071 = vmatprep.mubr.msk.f32.mxu0 %vm4223_vm0, %v4224_v4  ;;  %v624_v31 = vand.u32 4294901760, %v4522_v27 }
  0x67   :  { %3744 = vmatprep.subr.bf16.mxu0 %v4222_v0  ;;  %3776 = vmatpush3.bf16.msra.mxu1 %v4559_v52 }
  0x68   :  { %v4540_v40 = vsub.f32 %v4522_v27, %v624_v31  ;;  %3777 = vmatprep.subr.bf16.mxu1 %v4222_v0  ;;  %v642_v27 = vand.u32 4294901760, %v597_v16  ;;  %v4633_v39 = vpack.c.bf16 %v627_v32, %v624_v31  ;;  %v4657_v32 = vpack.c.bf16 %v4517_v23, %v4515_v22 }
  0x6a   :  { %3746 = vmatpush3.bf16.msra.mxu0 %v4382_v13  ;;  %v749_v63 = vand.u32 4294901760, %v4540_v40  ;;  %v4611_v46 = vsub.f32 %v597_v16, %v642_v27  ;;  %v4649_v31 = vpack.c.bf16 %v645_v28, %v642_v27  ;;  %v4661_v48 = vpack.c.bf16 %v4543_v41, %v4540_v40  ;;  %v2561_v27 = vld [vmem:[%s5266_s4] ss:$0 sm:$0xff] }
  0x6b   :  { %3747 = vmatprep.subr.bf16.mxu0 %v4222_v0 }
  0x6c   :  { %v750_v53 = vsub.f32 %v4540_v40, %v749_v63  ;;  %v4673_v2 = vpack.c.bf16 %v4613_v50, %v4611_v46 }
  0x6e   :  { %3749 = vmatpush3.bf16.msra.mxu0 %v4389_v25  ;;  %v751_v60 = vand.u32 4294901760, %v750_v53  ;;  %v4615_v53 = vpack.c.bf16 %v621_v21, %v618_v20 }
  0x6f   :  { %3750 = vmatprep.subr.bf16.mxu0 %v4222_v0 }
  0x70   :  { %v4583_v7 = vpack.c.bf16 %v758_v59, %v751_v60  ;;  %v5270_v60 = vand.u32 4294901760, %v4611_v46  ;;  %v5269_v59 = vand.u32 4294901760, %v4613_v50 }
  0x72   :  { %3779 = vmatpush3.bf16.msra.mxu1 %v4583_v7  ;;  %3752 = vmatpush3.bf16.msra.mxu0 %v4615_v53  ;;  %v792_v20 = vsub.f32 %v4611_v46, %v5270_v60  ;;  %v799_v21 = vsub.f32 %v4613_v50, %v5269_v59  ;;  %v4682_v59 = vpack.c.bf16 %v4380_v12, %v4376_v9 }
  0x73   :  { %3780 = vmatprep.subr.bf16.mxu1 %v4222_v0  ;;  %3753 = vmatprep.subr.bf16.mxu0 %v4222_v0  ;;  %v4773_v9 = vpack.c.bf16 %v728_v49, %v721_v44  ;;  %v4781_v12 = vpack.c.bf16 %v742_v30, %v735_v29 }
  0x74   :  { %v793_v16 = vand.u32 4294901760, %v792_v20  ;;  %v800_v17 = vand.u32 4294901760, %v799_v21 }
  0x76   :  { %3782 = vmatpush3.bf16.msra.mxu1 %v4617_v54  ;;  %3755 = vmatpush3.bf16.msra.mxu0 %v4633_v39  ;;  %v4639_v33 = vpack.c.bf16 %v800_v17, %v793_v16 }
  0x77   :  { %3783 = vmatprep.subr.bf16.mxu1 %v4222_v0  ;;  %3756 = vmatprep.subr.bf16.mxu0 %v4222_v0 }
  0x7a   :  { %3785 = vmatpush3.bf16.msra.mxu1 %v4625_v34  ;;  %3758 = vmatpush3.bf16.msra.mxu0 %v4641_v37 }
  0x7b   :  { %3786 = vmatprep.subr.bf16.mxu1 %v4222_v0  ;;  %3759 = vmatprep.subr.bf16.mxu0 %v4222_v0 }
  0x7e   :  { %3788 = vmatpush3.bf16.msra.mxu1 %v4639_v33  ;;  %3761 = vmatpush3.bf16.msra.mxu0 %v4643_v42 }
  0x7f   :  { %3789 = vmatprep.subr.bf16.mxu1 %v4222_v0  ;;  %3762 = vmatprep.subr.bf16.mxu0 %v4222_v0 }
  0x82   :  { %3764 = vmatpush3.bf16.msra.mxu0 %v4649_v31 }
  0x83   :  { %3885 = vmatprep.subr.bf16.mxu0 %v4222_v0 }
 0x138   :  { %v574_v28 = vpop.f32.mrb[0].mxu0 }
 0x139   :  { %v4173_v45 = vadd.f32 %v2561_v27, %v574_v28  ;;  %v3038_v57 = vpop.f32.mrb[1].mxu0  ;;  %v4693_v28 = vpack.c.bf16 %v4387_v24, %v4384_v14  ;;  %v4789_v14 = vpack.c.bf16 %v756_v47, %v749_v63  ;;  %v4805_v24 = vpack.c.bf16 %v784_v18, %v777_v15 }
 0x13a   :  { %v1928_v15 = vand.u32 4294901760, %v1899_v8  ;;  %v1931_v18 = vand.u32 4294901760, %v1900_v10 }
 0x13b   :  { %v579_v58 = vmul.f32 0.70710677, %v4173_v45  ;;  %v578_v21 = vmul.f32 0.5, %v4173_v45 }
 0x13d   :  { %4218 = verf.f32 %v579_v58  ;;  %v4701_v58 = vpack.c.bf16 %v4400_v38, %v4391_v26  ;;  %v5277_v26 = vand.u32 4294901760, %v4611_v46  ;;  %v4979_v46 = vpack.c.bf16 %v1931_v18, %v1928_v15 }
 0x147   :  { %v4219_v20 = vpop.eup %4218 }
 0x148   :  { %v581_v16 = vadd.f32 1.0, %v4219_v20 }
 0x14a   :  { %v4678_v17 = vmul.f32 %v581_v16, %v578_v21  ;;  %v4755_v21 = vpack.c.bf16 %v700_v35, %v693_v19  ;;  %v4763_v16 = vpack.c.bf16 %v714_v43, %v707_v36  ;;  %v4797_v19 = vpack.c.bf16 %v770_v5, %v763_v3 }
 0x14b   :  { %v5278_v35 = vand.u32 4294901760, %v4613_v50  ;;  %v1901_v50 = vld [vmem:[%s5267_s2 + $0x30] sm:$0xff] }
 0x14c   :  { %v4685_v60 = vand.u32 4294901760, %v4678_v17 }
 0x14d   :  { %v4813_v36 = vpack.c.bf16 %v5278_v35, %v5277_v26 }
 0x14e   :  { %3107 = vmatmul.mubr.f32.vlgmr.msra.gmra.mrb[0].mxu1 %v4685_v60  ;;  %v681_v27 = vsub.f32 %v4678_v17, %v4685_v60 }
 0x14f   :  { %3791 = vmatpush3.bf16.msra.mxu1 %v4682_v59  ;;  %3141 = vmatprep.mubr.msk.f32.mxu1 %vm4223_vm0, %v4224_v4 }
 0x150   :  { %3792 = vmatprep.subr.bf16.mxu1 %v4222_v0  ;;  %v682_v45 = vand.u32 4294901760, %v681_v27 }
 0x152   :  { %v683_v57 = vsub.f32 %v681_v27, %v682_v45 }
 0x153   :  { %3794 = vmatpush3.bf16.msra.mxu1 %v4693_v28 }
 0x154   :  { %3795 = vmatprep.subr.bf16.mxu1 %v4222_v0  ;;  %v684_v20 = vand.u32 4294901760, %v683_v57  ;;  %v1909_v57 = vld [vmem:[%s5267_s2 + $0x70] sm:$0xff] }
 0x155   :  { %v1958_v35 = vand.u32 4294901760, %v1909_v57 }
 0x156   :  { %3072 = vmatmul.mubr.f32.vlgmr.msra.gmra.mrb[2].mxu0 %v684_v20 }
 0x157   :  { %3797 = vmatpush3.bf16.msra.mxu1 %v4701_v58  ;;  %3887 = vmatpush3.bf16.msra.mxu0 %v4378_v11 }
 0x158   :  { %3798 = vmatprep.subr.bf16.mxu1 %v4222_v0  ;;  %3888 = vmatprep.subr.bf16.mxu0 %v4222_v0 }
 0x159   :  { %3281 = vmatprep.mubr.msk.f32.mxu0 %vm4223_vm0, %v4224_v4 }
 0x15b   :  { %3800 = vmatpush3.bf16.msra.mxu1 %v4657_v32  ;;  %3890 = vmatpush3.bf16.msra.mxu0 %v4382_v13 }
 0x15c   :  { %3801 = vmatprep.subr.bf16.mxu1 %v4222_v0  ;;  %3891 = vmatprep.subr.bf16.mxu0 %v4222_v0 }
 0x15f   :  { %3803 = vmatpush3.bf16.msra.mxu1 %v4661_v48  ;;  %3893 = vmatpush3.bf16.msra.mxu0 %v4389_v25 }
 0x160   :  { %3804 = vmatprep.subr.bf16.mxu1 %v4222_v0  ;;  %3894 = vmatprep.subr.bf16.mxu0 %v4222_v0 }
 0x163   :  { %3806 = vmatpush3.bf16.msra.mxu1 %v4665_v51  ;;  %3896 = vmatpush3.bf16.msra.mxu0 %v4615_v53 }
 0x164   :  { %3807 = vmatprep.subr.bf16.mxu1 %v4222_v0  ;;  %3897 = vmatprep.subr.bf16.mxu0 %v4222_v0 }
 0x167   :  { %3809 = vmatpush3.bf16.msra.mxu1 %v4669_v1  ;;  %3899 = vmatpush3.bf16.msra.mxu0 %v4633_v39 }
 0x168   :  { %3810 = vmatprep.subr.bf16.mxu1 %v4222_v0  ;;  %3900 = vmatprep.subr.bf16.mxu0 %v4222_v0 }
 0x16b   :  { %3812 = vmatpush3.bf16.msra.mxu1 %v4673_v2  ;;  %3902 = vmatpush3.bf16.msra.mxu0 %v4641_v37 }
 0x16c   :  { %3813 = vmatprep.subr.bf16.mxu1 %v4222_v0  ;;  %3903 = vmatprep.subr.bf16.mxu0 %v4222_v0 }
 0x16e   :  { %3142 = vmatmul.mubr.f32.vlgmr.msra.gmra.mrb[0].mxu1 %v681_v27  ;;  %v5015_v27 = vsub.f32 %v1900_v10, %v1931_v18 }
 0x16f   :  { %3815 = vmatpush3.bf16.msra.mxu1 %v4378_v11  ;;  %3176 = vmatprep.mubr.msk.f32.mxu1 %vm4223_vm0, %v4224_v4 }
 0x170   :  { %3816 = vmatprep.subr.bf16.mxu1 %v4222_v0  ;;  %3905 = vmatpush3.bf16.msra.mxu0 %v4643_v42  ;;  %v2044_v10 = vand.u32 4294901760, %v5015_v27 }
 0x171   :  { %3906 = vmatprep.subr.bf16.mxu0 %v4222_v0 }
 0x173   :  { %3818 = vmatpush3.bf16.msra.mxu1 %v4382_v13 }
 0x174   :  { %3819 = vmatprep.subr.bf16.mxu1 %v4222_v0  ;;  %3908 = vmatpush3.bf16.msra.mxu0 %v4649_v31 }
 0x175   :  { %3909 = vmatprep.subr.bf16.mxu0 %v4222_v0 }
 0x177   :  { %3821 = vmatpush3.bf16.msra.mxu1 %v4389_v25 }
 0x178   :  { %3822 = vmatprep.subr.bf16.mxu1 %v4222_v0 }
 0x17b   :  { %3824 = vmatpush3.bf16.msra.mxu1 %v4615_v53 }
 0x17c   :  { %3825 = vmatprep.subr.bf16.mxu1 %v4222_v0 }
 0x17f   :  { %3827 = vmatpush3.bf16.msra.mxu1 %v4633_v39 }
 0x180   :  { %3828 = vmatprep.subr.bf16.mxu1 %v4222_v0 }
 0x183   :  { %3830 = vmatpush3.bf16.msra.mxu1 %v4641_v37 }
 0x184   :  { %3831 = vmatprep.subr.bf16.mxu1 %v4222_v0 }
 0x187   :  { %3833 = vmatpush3.bf16.msra.mxu1 %v4643_v42 }
 0x188   :  { %3834 = vmatprep.subr.bf16.mxu1 %v4222_v0 }
 0x18b   :  { %3836 = vmatpush3.bf16.msra.mxu1 %v4649_v31 }
 0x18c   :  { %3837 = vmatprep.subr.bf16.mxu1 %v4222_v0 }
 0x18e   :  { %3177 = vmatmul.mubr.f32.vlgmr.msra.gmra.mrb[0].mxu1 %v682_v45  ;;  %v1908_v45 = vld [vmem:[%s5267_s2 + $0x68] sm:$0xff] }
 0x18f   :  { %3839 = vmatpush3.bf16.msra.mxu1 %v4755_v21  ;;  %3211 = vmatprep.mubr.msk.f32.mxu1 %vm4223_vm0, %v4224_v4  ;;  %v1955_v26 = vand.u32 4294901760, %v1908_v45 }
 0x190   :  { %3840 = vmatprep.subr.bf16.mxu1 %v4222_v0 }
 0x193   :  { %3842 = vmatpush3.bf16.msra.mxu1 %v4763_v16 }
 0x194   :  { %3843 = vmatprep.subr.bf16.mxu1 %v4222_v0 }
 0x197   :  { %3845 = vmatpush3.bf16.msra.mxu1 %v4773_v9 }
 0x198   :  { %3846 = vmatprep.subr.bf16.mxu1 %v4222_v0 }
 0x19b   :  { %3848 = vmatpush3.bf16.msra.mxu1 %v4781_v12 }
 0x19c   :  { %3849 = vmatprep.subr.bf16.mxu1 %v4222_v0 }
 0x19f   :  { %3851 = vmatpush3.bf16.msra.mxu1 %v4789_v14 }
 0x1a0   :  { %3852 = vmatprep.subr.bf16.mxu1 %v4222_v0 }
 0x1a3   :  { %3854 = vmatpush3.bf16.msra.mxu1 %v4797_v19 }
 0x1a4   :  { %3855 = vmatprep.subr.bf16.mxu1 %v4222_v0 }
 0x1a7   :  { %3857 = vmatpush3.bf16.msra.mxu1 %v4805_v24 }
 0x1a8   :  { %3858 = vmatprep.subr.bf16.mxu1 %v4222_v0 }
 0x1ab   :  { %3860 = vmatpush3.bf16.msra.mxu1 %v4813_v36 }
 0x1ac   :  { %3861 = vmatprep.subr.bf16.mxu1 %v4222_v0 }
 0x1ae   :  { %3212 = vmatmul.mubr.f32.vlgmr.msra.gmra.mrb[0].mxu1 %v4685_v60 }
 0x1af   :  { %3863 = vmatpush3.bf16.msra.mxu1 %v4378_v11  ;;  %3246 = vmatprep.mubr.msk.f32.mxu1 %vm4223_vm0, %v4224_v4 }
 0x1b0   :  { %3864 = vmatprep.subr.bf16.mxu1 %v4222_v0 }
 0x1b3   :  { %3866 = vmatpush3.bf16.msra.mxu1 %v4382_v13 }
 0x1b4   :  { %3867 = vmatprep.subr.bf16.mxu1 %v4222_v0 }
 0x1b7   :  { %3869 = vmatpush3.bf16.msra.mxu1 %v4389_v25 }
 0x1b8   :  { %3870 = vmatprep.subr.bf16.mxu1 %v4222_v0 }
 0x1bb   :  { %3872 = vmatpush3.bf16.msra.mxu1 %v4615_v53 }
 0x1bc   :  { %3873 = vmatprep.subr.bf16.mxu1 %v4222_v0 }
 0x1bf   :  { %3875 = vmatpush3.bf16.msra.mxu1 %v4633_v39 }
 0x1c0   :  { %3876 = vmatprep.subr.bf16.mxu1 %v4222_v0 }
 0x1c3   :  { %3878 = vmatpush3.bf16.msra.mxu1 %v4641_v37 }
 0x1c4   :  { %3879 = vmatprep.subr.bf16.mxu1 %v4222_v0 }
 0x1c7   :  { %3881 = vmatpush3.bf16.msra.mxu1 %v4643_v42 }
 0x1c8   :  { %3882 = vmatprep.subr.bf16.mxu1 %v4222_v0 }
 0x1cb   :  { %3884 = vmatpush3.bf16.msra.mxu1 %v4649_v31 }
 0x1cc   :  { %4029 = vmatprep.subr.bf16.mxu1 %v4222_v0 }
 0x1ce   :  { %3247 = vmatmul.mubr.f32.vlgmr.msra.gmra.mrb[0].mxu1 %v4685_v60 }
 0x1cf   :  { %3491 = vmatprep.mubr.msk.f32.mxu1 %vm4223_vm0, %v4224_v4 }
 0x229   :  { %v686_v38 = vpop.f32.mrb[2].mxu0 }
 0x22a   :  { %v3073_v43 = vpop.f32.mrb[3].mxu0 }
 0x2a1   :  { %v1236_v44 = vpop.f32.mrb[0].mxu1 }
 0x2a2   :  { %v4174_v49 = vadd.f32 %v1236_v44, %v686_v38  ;;  %v3248_v22 = vpop.f32.mrb[1].mxu1  ;;  %v5049_v44 = vsub.f32 %v1908_v45, %v1955_v26 }
 0x2a4   :  { %v4841_v23 = vsub.f32 %v4678_v17, %v4174_v49  ;;  %v5013_v17 = vsub.f32 %v1899_v8, %v1928_v15  ;;  %v5051_v49 = vsub.f32 %v1909_v57, %v1958_v35 }
 0x2a6   :  { %v1241_v29 = vmul.f32 %v4841_v23, %v4841_v23  ;;  %v2037_v8 = vand.u32 4294901760, %v5013_v17 }
 0x2a8   :  { %v4845_v30 = vand.u32 4294901760, %v1241_v29  ;;  %v2038_v18 = vsub.f32 %v5013_v17, %v2037_v8 }
 0x2aa   :  { %v4848_v40 = vsub.f32 %v1241_v29, %v4845_v30 }
 0x2ac   :  { %v1325_v41 = vand.u32 4294901760, %v4848_v40 }
 0x2ae   :  { %v1326_v63 = vsub.f32 %v4848_v40, %v1325_v41 }
 0x2b0   :  { %v1327_v47 = vand.u32 4294901760, %v1326_v63 }
 0x2b2   :  { %3282 = vmatmul.mubr.f32.vlgmr.msra.gmra.mrb[4].mxu0 %v1327_v47 }
 0x2b3   :  { %3911 = vmatpush3.bf16.msra.mxu0 %v4425_v61  ;;  %3316 = vmatprep.mubr.msk.f32.mxu0 %vm4223_vm0, %v4224_v4  ;;  %v1895_v61 = vld [vmem:[%s5267_s2] sm:$0xff] }
 0x2b4   :  { %3912 = vmatprep.subr.bf16.mxu0 %v4222_v0 }
 0x2b7   :  { %3914 = vmatpush3.bf16.msra.mxu0 %v4428_v62  ;;  %v1896_v62 = vld [vmem:[%s5267_s2 + $0x8] sm:$0xff] }
 0x2b8   :  { %3915 = vmatprep.subr.bf16.mxu0 %v4222_v0 }
 0x2bb   :  { %3917 = vmatpush3.bf16.msra.mxu0 %v4437_v6  ;;  %v1916_v6 = vand.u32 4294901760, %v1895_v61 }
 0x2bc   :  { %3918 = vmatprep.subr.bf16.mxu0 %v4222_v0 }
 0x2bd   :  { %v4885_v56 = vsub.f32 %v1895_v61, %v1916_v6 }
 0x2bf   :  { %3920 = vmatpush3.bf16.msra.mxu0 %v4559_v52  ;;  %v1919_v52 = vand.u32 4294901760, %v1896_v62  ;;  %v2009_v29 = vand.u32 4294901760, %v4885_v56 }
 0x2c0   :  { %3921 = vmatprep.subr.bf16.mxu0 %v4222_v0 }
 0x2c1   :  { %v4883_v55 = vpack.c.bf16 %v1919_v52, %v1916_v6  ;;  %v4887_v3 = vsub.f32 %v1896_v62, %v1919_v52 }
 0x2c3   :  { %3923 = vmatpush3.bf16.msra.mxu0 %v4583_v7  ;;  %4031 = vmatpush3.bf16.msra.mxu1 %v4883_v55 }
 0x2c4   :  { %3924 = vmatprep.subr.bf16.mxu0 %v4222_v0  ;;  %4032 = vmatprep.subr.bf16.mxu1 %v4222_v0 }
 0x2c7   :  { %3926 = vmatpush3.bf16.msra.mxu0 %v4617_v54  ;;  %v1934_v54 = vand.u32 4294901760, %v1901_v50 }
 0x2c8   :  { %3927 = vmatprep.subr.bf16.mxu0 %v4222_v0 }
 0x2cb   :  { %3929 = vmatpush3.bf16.msra.mxu0 %v4625_v34  ;;  %v1903_v34 = vld [vmem:[%s5267_s2 + $0x40] sm:$0xff] }
 0x2cc   :  { %3930 = vmatprep.subr.bf16.mxu0 %v4222_v0 }
 0x2cf   :  { %3932 = vmatpush3.bf16.msra.mxu0 %v4639_v33  ;;  %v1940_v33 = vand.u32 4294901760, %v1903_v34 }
 0x2d0   :  { %3933 = vmatprep.subr.bf16.mxu0 %v4222_v0 }
 0x2d2   :  { %3317 = vmatmul.mubr.f32.vlgmr.msra.gmra.mrb[4].mxu0 %v4845_v30 }
 0x2d3   :  { %3935 = vmatpush3.bf16.msra.mxu0 %v4682_v59  ;;  %3351 = vmatprep.mubr.msk.f32.mxu0 %vm4223_vm0, %v4224_v4 }
 0x2d4   :  { %3936 = vmatprep.subr.bf16.mxu0 %v4222_v0 }
 0x2d7   :  { %3938 = vmatpush3.bf16.msra.mxu0 %v4693_v28  ;;  %v1907_v28 = vld [vmem:[%s5267_s2 + $0x60] sm:$0xff] }
 0x2d8   :  { %3939 = vmatprep.subr.bf16.mxu0 %v4222_v0 }
 0x2db   :  { %3941 = vmatpush3.bf16.msra.mxu0 %v4701_v58  ;;  %v5026_v58 = vsub.f32 %v1901_v50, %v1934_v54  ;;  %v2045_v50 = vsub.f32 %v5015_v27, %v2044_v10 }
 0x2dc   :  { %3942 = vmatprep.subr.bf16.mxu0 %v4222_v0 }
 0x2df   :  { %3944 = vmatpush3.bf16.msra.mxu0 %v4657_v32  ;;  %v1906_v32 = vld [vmem:[%s5267_s2 + $0x58] sm:$0xff] }
 0x2e0   :  { %3945 = vmatprep.subr.bf16.mxu0 %v4222_v0 }
 0x2e3   :  { %3947 = vmatpush3.bf16.msra.mxu0 %v4661_v48 }
 0x2e4   :  { %3948 = vmatprep.subr.bf16.mxu0 %v4222_v0 }
 0x2e7   :  { %3950 = vmatpush3.bf16.msra.mxu0 %v4665_v51  ;;  %v1949_v51 = vand.u32 4294901760, %v1906_v32 }
 0x2e8   :  { %3951 = vmatprep.subr.bf16.mxu0 %v4222_v0 }
 0x2eb   :  { %3953 = vmatpush3.bf16.msra.mxu0 %v4669_v1 }
 0x2ec   :  { %3954 = vmatprep.subr.bf16.mxu0 %v4222_v0 }
 0x2ef   :  { %3956 = vmatpush3.bf16.msra.mxu0 %v4673_v2 }
 0x2f0   :  { %3957 = vmatprep.subr.bf16.mxu0 %v4222_v0 }
 0x2f2   :  { %3352 = vmatmul.mubr.f32.vlgmr.msra.gmra.mrb[4].mxu0 %v4848_v40 }
 0x2f3   :  { %3959 = vmatpush3.bf16.msra.mxu0 %v4378_v11  ;;  %3386 = vmatprep.mubr.msk.f32.mxu0 %vm4223_vm0, %v4224_v4 }
 0x2f4   :  { %3960 = vmatprep.subr.bf16.mxu0 %v4222_v0 }
 0x2f7   :  { %3962 = vmatpush3.bf16.msra.mxu0 %v4382_v13 }
 0x2f8   :  { %3963 = vmatprep.subr.bf16.mxu0 %v4222_v0 }
 0x2fb   :  { %3965 = vmatpush3.bf16.msra.mxu0 %v4389_v25 }
 0x2fc   :  { %3966 = vmatprep.subr.bf16.mxu0 %v4222_v0 }
 0x2ff   :  { %3968 = vmatpush3.bf16.msra.mxu0 %v4615_v53 }
 0x300   :  { %3969 = vmatprep.subr.bf16.mxu0 %v4222_v0 }
 0x303   :  { %3971 = vmatpush3.bf16.msra.mxu0 %v4633_v39 }
 0x304   :  { %3972 = vmatprep.subr.bf16.mxu0 %v4222_v0 }
 0x307   :  { %3974 = vmatpush3.bf16.msra.mxu0 %v4641_v37 }
 0x308   :  { %3975 = vmatprep.subr.bf16.mxu0 %v4222_v0 }
 0x30b   :  { %3977 = vmatpush3.bf16.msra.mxu0 %v4643_v42 }
 0x30c   :  { %3978 = vmatprep.subr.bf16.mxu0 %v4222_v0 }
 0x30f   :  { %3980 = vmatpush3.bf16.msra.mxu0 %v4649_v31 }
 0x310   :  { %3981 = vmatprep.subr.bf16.mxu0 %v4222_v0 }
 0x312   :  { %3387 = vmatmul.mubr.f32.vlgmr.msra.gmra.mrb[4].mxu0 %v1325_v41  ;;  %v2010_v41 = vsub.f32 %v4885_v56, %v2009_v29 }
 0x313   :  { %3983 = vmatpush3.bf16.msra.mxu0 %v4755_v21  ;;  %3421 = vmatprep.mubr.msk.f32.mxu0 %vm4223_vm0, %v4224_v4  ;;  %v5030_v21 = vsub.f32 %v1903_v34, %v1940_v33 }
 0x314   :  { %3984 = vmatprep.subr.bf16.mxu0 %v4222_v0  ;;  %v2011_v47 = vand.u32 4294901760, %v2010_v41 }
 0x317   :  { %3986 = vmatpush3.bf16.msra.mxu0 %v4763_v16 }
 0x318   :  { %3987 = vmatprep.subr.bf16.mxu0 %v4222_v0 }
 0x31b   :  { %3989 = vmatpush3.bf16.msra.mxu0 %v4773_v9  ;;  %v1910_v9 = vld [vmem:[%s5267_s2 + $0x78] sm:$0xff] }
 0x31c   :  { %3990 = vmatprep.subr.bf16.mxu0 %v4222_v0  ;;  %v1961_v38 = vand.u32 4294901760, %v1910_v9 }
 0x31e   :  { %v5053_v22 = vsub.f32 %v1910_v9, %v1961_v38  ;;  %v5058_v40 = vpack.c.bf16 %v1961_v38, %v1958_v35 }
 0x31f   :  { %3992 = vmatpush3.bf16.msra.mxu0 %v4781_v12 }
 0x320   :  { %3993 = vmatprep.subr.bf16.mxu0 %v4222_v0 }
 0x323   :  { %3995 = vmatpush3.bf16.msra.mxu0 %v4789_v14 }
 0x324   :  { %3996 = vmatprep.subr.bf16.mxu0 %v4222_v0 }
 0x327   :  { %3998 = vmatpush3.bf16.msra.mxu0 %v4797_v19  ;;  %v5041_v19 = vsub.f32 %v1906_v32, %v1949_v51 }
 0x328   :  { %3999 = vmatprep.subr.bf16.mxu0 %v4222_v0 }
 0x329   :  { %v5275_v35 = vand.u32 4294901760, %v5041_v19 }
 0x32b   :  { %4001 = vmatpush3.bf16.msra.mxu0 %v4805_v24  ;;  %v1952_v24 = vand.u32 4294901760, %v1907_v28 }
 0x32c   :  { %4002 = vmatprep.subr.bf16.mxu0 %v4222_v0 }
 0x32d   :  { %v5047_v43 = vpack.c.bf16 %v1955_v26, %v1952_v24 }
 0x32f   :  { %4004 = vmatpush3.bf16.msra.mxu0 %v4813_v36  ;;  %v5044_v36 = vsub.f32 %v1907_v28, %v1952_v24 }
 0x330   :  { %4005 = vmatprep.subr.bf16.mxu0 %v4222_v0 }
 0x332   :  { %3422 = vmatmul.mubr.f32.vlgmr.msra.gmra.mrb[4].mxu0 %v4845_v30 }
 0x333   :  { %4007 = vmatpush3.bf16.msra.mxu0 %v4378_v11  ;;  %3456 = vmatprep.mubr.msk.f32.mxu0 %vm4223_vm0, %v4224_v4  ;;  %v1897_v11 = vld [vmem:[%s5267_s2 + $0x10] sm:$0xff] }
 0x334   :  { %4008 = vmatprep.subr.bf16.mxu0 %v4222_v0 }
 0x337   :  { %4010 = vmatpush3.bf16.msra.mxu0 %v4382_v13  ;;  %v1898_v13 = vld [vmem:[%s5267_s2 + $0x18] sm:$0xff] }
 0x338   :  { %4011 = vmatprep.subr.bf16.mxu0 %v4222_v0  ;;  %v1925_v5 = vand.u32 4294901760, %v1898_v13 }
 0x33a   :  { %v5011_v2 = vsub.f32 %v1898_v13, %v1925_v5 }
 0x33b   :  { %4013 = vmatpush3.bf16.msra.mxu0 %v4389_v25  ;;  %v1922_v25 = vand.u32 4294901760, %v1897_v11 }
 0x33c   :  { %4014 = vmatprep.subr.bf16.mxu0 %v4222_v0  ;;  %v2030_v6 = vand.u32 4294901760, %v5011_v2 }
 0x33d   :  { %v4969_v7 = vpack.c.bf16 %v1925_v5, %v1922_v25  ;;  %v5009_v1 = vsub.f32 %v1897_v11, %v1922_v25 }
 0x33e   :  { %v2031_v13 = vsub.f32 %v5011_v2, %v2030_v6 }
 0x33f   :  { %4016 = vmatpush3.bf16.msra.mxu0 %v4615_v53  ;;  %4034 = vmatpush3.bf16.msra.mxu1 %v4969_v7  ;;  %v1902_v53 = vld [vmem:[%s5267_s2 + $0x38] sm:$0xff]  ;;  %v2023_v62 = vand.u32 4294901760, %v5009_v1 }
 0x340   :  { %4017 = vmatprep.subr.bf16.mxu0 %v4222_v0  ;;  %4035 = vmatprep.subr.bf16.mxu1 %v4222_v0  ;;  %v1937_v60 = vand.u32 4294901760, %v1902_v53  ;;  %v2032_v5 = vand.u32 4294901760, %v2031_v13  ;;  %v5273_v13 = vand.u32 4294901760, %v5049_v44 }
 0x341   :  { %v2024_v11 = vsub.f32 %v5009_v1, %v2023_v62 }
 0x342   :  { %v4989_v59 = vpack.c.bf16 %v1937_v60, %v1934_v54  ;;  %v5028_v20 = vsub.f32 %v1902_v53, %v1937_v60  ;;  %v2039_v53 = vand.u32 4294901760, %v2038_v18  ;;  %v2046_v54 = vand.u32 4294901760, %v2045_v50 }
 0x343   :  { %4019 = vmatpush3.bf16.msra.mxu0 %v4633_v39  ;;  %4037 = vmatpush3.bf16.msra.mxu1 %v4979_v46  ;;  %v1904_v39 = vld [vmem:[%s5267_s2 + $0x48] sm:$0xff]  ;;  %v2025_v25 = vand.u32 4294901760, %v2024_v11  ;;  %v2051_v60 = vand.u32 4294901760, %v5026_v58  ;;  %v5274_v11 = vand.u32 4294901760, %v5044_v36  ;;  %v2101_v18 = vsub.f32 %v5049_v44, %v5273_v13 }
 0x344   :  { %4020 = vmatprep.subr.bf16.mxu0 %v4222_v0  ;;  %4038 = vmatprep.subr.bf16.mxu1 %v4222_v0  ;;  %v2058_v34 = vand.u32 4294901760, %v5028_v20 }
 0x345   :  { %v5081_v15 = vpack.c.bf16 %v2032_v5, %v2025_v25  ;;  %v2094_v5 = vsub.f32 %v5044_v36, %v5274_v11 }
 0x347   :  { %4022 = vmatpush3.bf16.msra.mxu0 %v4641_v37  ;;  %4040 = vmatpush3.bf16.msra.mxu1 %v4989_v59  ;;  %v1943_v37 = vand.u32 4294901760, %v1904_v39  ;;  %v2095_v50 = vand.u32 4294901760, %v2094_v5 }
 0x348   :  { %4023 = vmatprep.subr.bf16.mxu0 %v4222_v0  ;;  %4041 = vmatprep.subr.bf16.mxu1 %v4222_v0 }
 0x349   :  { %v5032_v16 = vsub.f32 %v1904_v39, %v1943_v37  ;;  %v4060_v39 = vpack.c.bf16 %v2046_v54, %v2039_v53  ;;  %v2102_v53 = vand.u32 4294901760, %v2101_v18  ;;  %v5272_v54 = vand.u32 4294901760, %v5051_v49 }
 0x34a   :  { %v4096_v18 = vpack.c.bf16 %v5049_v44, %v5044_v36 }
 0x34b   :  { %4025 = vmatpush3.bf16.msra.mxu0 %v4643_v42  ;;  %v4999_v42 = vpack.c.bf16 %v1943_v37, %v1940_v33  ;;  %v2052_v33 = vsub.f32 %v5026_v58, %v2051_v60  ;;  %v2059_v37 = vsub.f32 %v5028_v20, %v2058_v34 }
 0x34c   :  { %4026 = vmatprep.subr.bf16.mxu0 %v4222_v0 }
 0x34d   :  { %4043 = vmatpush3.bf16.msra.mxu1 %v4999_v42  ;;  %v2060_v32 = vand.u32 4294901760, %v2059_v37  ;;  %v4072_v37 = vpack.c.bf16 %v2102_v53, %v2095_v50  ;;  %v4099_v50 = vpack.c.bf16 %v5053_v22, %v5051_v49 }
 0x34e   :  { %4044 = vmatprep.subr.bf16.mxu1 %v4222_v0 }
 0x34f   :  { %4028 = vmatpush3.bf16.msra.mxu0 %v4649_v31  ;;  %v1905_v31 = vld [vmem:[%s5267_s2 + $0x50] sm:$0xff] }
 0x350   :  { %v1946_v48 = vand.u32 4294901760, %v1905_v31 }
 0x352   :  { %3457 = vmatmul.mubr.f32.vlgmr.msra.gmra.mrb[4].mxu0 %v4845_v30  ;;  %v5037_v12 = vpack.c.bf16 %v1949_v51, %v1946_v48  ;;  %v5039_v14 = vsub.f32 %v1905_v31, %v1946_v48  ;;  %v2016_v30 = vand.u32 4294901760, %v4887_v3  ;;  %v2053_v31 = vand.u32 4294901760, %v2052_v33 }
 0x353   :  { %v2065_v48 = vand.u32 4294901760, %v5030_v21  ;;  %v2072_v51 = vand.u32 4294901760, %v5032_v16  ;;  %v5271_v33 = vand.u32 4294901760, %v5053_v22 }
 0x354   :  { %4046 = vmatpush3.bf16.msra.mxu1 %v5037_v12  ;;  %v2017_v63 = vsub.f32 %v4887_v3, %v2016_v30  ;;  %v4063_v28 = vpack.c.bf16 %v2060_v32, %v2053_v31  ;;  %v5276_v26 = vand.u32 4294901760, %v5039_v14  ;;  %v2108_v31 = vsub.f32 %v5051_v49, %v5272_v54  ;;  %v2563_v54 = vld [vmem:[%s5266_s4 + $0x2] ss:$0 sm:$0xff] }
 0x355   :  { %4047 = vmatprep.subr.bf16.mxu1 %v4222_v0  ;;  %v2066_v45 = vsub.f32 %v5030_v21, %v2065_v48  ;;  %v2073_v57 = vsub.f32 %v5032_v16, %v2072_v51  ;;  %v2115_v32 = vsub.f32 %v5053_v22, %v5271_v33  ;;  %v4093_v5 = vpack.c.bf16 %v5041_v19, %v5039_v14 }
 0x356   :  { %v2018_v61 = vand.u32 4294901760, %v2017_v63  ;;  %v2080_v41 = vsub.f32 %v5039_v14, %v5276_v26  ;;  %v2087_v63 = vsub.f32 %v5041_v19, %v5275_v35 }
 0x357   :  { %v2067_v9 = vand.u32 4294901760, %v2066_v45  ;;  %v2074_v24 = vand.u32 4294901760, %v2073_v57  ;;  %v2109_v45 = vand.u32 4294901760, %v2108_v31  ;;  %v2116_v57 = vand.u32 4294901760, %v2115_v32 }
 0x358   :  { %4049 = vmatpush3.bf16.msra.mxu1 %v5047_v43  ;;  %v5070_v52 = vpack.c.bf16 %v2018_v61, %v2011_v47  ;;  %v2081_v47 = vand.u32 4294901760, %v2080_v41  ;;  %v2088_v61 = vand.u32 4294901760, %v2087_v63  ;;  %v4081_v41 = vpack.c.bf16 %v5011_v2, %v5009_v1 }
 0x359   :  { %4050 = vmatprep.subr.bf16.mxu1 %v4222_v0  ;;  %v4066_v38 = vpack.c.bf16 %v2074_v24, %v2067_v9  ;;  %v4075_v9 = vpack.c.bf16 %v2116_v57, %v2109_v45  ;;  %v4078_v24 = vpack.c.bf16 %v4887_v3, %v4885_v56  ;;  %v4084_v63 = vpack.c.bf16 %v5015_v27, %v5013_v17  ;;  %v2562_v57 = vld [vmem:[%s5266_s4 + $0x1] ss:$0 sm:$0xff] }
 0x35a   :  { %v4069_v25 = vpack.c.bf16 %v2088_v61, %v2081_v47  ;;  %v4087_v47 = vpack.c.bf16 %v5028_v20, %v5026_v58  ;;  %v4090_v61 = vpack.c.bf16 %v5032_v16, %v5030_v21  ;;  %v4132_v56 = vpack.c.bf16 %v2044_v10, %v2037_v8 }
 0x35b   :  { %v4135_v3 = vpack.c.bf16 %v2058_v34, %v2051_v60  ;;  %v4138_v1 = vpack.c.bf16 %v2072_v51, %v2065_v48  ;;  %v5279_v2 = vand.u32 4294901760, %v5039_v14  ;;  %v5280_v17 = vand.u32 4294901760, %v5041_v19 }
 0x35c   :  { %4052 = vmatpush3.bf16.msra.mxu1 %v5058_v40  ;;  %v5281_v58 = vand.u32 4294901760, %v5044_v36  ;;  %v5282_v20 = vand.u32 4294901760, %v5049_v44  ;;  %v5283_v21 = vand.u32 4294901760, %v5051_v49  ;;  %v5284_v16 = vand.u32 4294901760, %v5053_v22 }
 0x35d   :  { %4053 = vmatprep.subr.bf16.mxu1 %v4222_v0  ;;  %v4141_v27 = vpack.c.bf16 %v5280_v17, %v5279_v2 }
 0x425   :  { %v1879_v53 = vpop.f32.mrb[4].mxu0 }
 0x426   :  { %v4175_v31 = vadd.f32 1e-05, %v1879_v53  ;;  %v3458_v32 = vpop.f32.mrb[5].mxu0 }
 0x428   :  { %4220 = vrsqrt.f32 %v4175_v31 }
 0x432   :  { %v4221_v45 = vpop.eup %4220 }
 0x433   :  { %v1884_v33 = vmul.f32 %v4221_v45, %v4841_v23  ;;  %v4126_v23 = vpack.c.bf16 %v2016_v30, %v2009_v29  ;;  %v4144_v29 = vpack.c.bf16 %v5282_v20, %v5281_v58  ;;  %v4147_v30 = vpack.c.bf16 %v5284_v16, %v5283_v21 }
 0x435   :  { %v1889_v13 = vmul.f32 %v2562_v57, %v1884_v33 }
 0x437   :  { %v1894_v11 = vadd.f32 %v2563_v54, %v1889_v13 }
 0x439   :  { %v5152_v35 = vand.u32 4294901760, %v1894_v11 }
 0x43b   :  { %v1997_v26 = vsub.f32 %v1894_v11, %v5152_v35 }
 0x43d   :  { %v1998_v53 = vand.u32 4294901760, %v1997_v26 }
 0x43f   :  { %v1999_v32 = vsub.f32 %v1997_v26, %v1998_v53 }
 0x441   :  { %v2000_v31 = vand.u32 4294901760, %v1999_v32 }
 0x443   :  { %3492 = vmatmul.mubr.f32.vlgmr.msra.gmra.mrb[2].mxu1 %v2000_v31 }
 0x444   :  { %4055 = vmatpush3.bf16.msra.mxu1 %v5070_v52  ;;  %3526 = vmatprep.mubr.msk.f32.mxu1 %vm4223_vm0, %v4224_v4  ;;  %v4129_v52 = vpack.c.bf16 %v2030_v6, %v2023_v62 }
 0x445   :  { %4056 = vmatprep.subr.bf16.mxu1 %v4222_v0 }
 0x448   :  { %4058 = vmatpush3.bf16.msra.mxu1 %v5081_v15 }
 0x449   :  { %4059 = vmatprep.subr.bf16.mxu1 %v4222_v0 }
 0x44c   :  { %4061 = vmatpush3.bf16.msra.mxu1 %v4060_v39 }
 0x44d   :  { %4062 = vmatprep.subr.bf16.mxu1 %v4222_v0 }
 0x450   :  { %4064 = vmatpush3.bf16.msra.mxu1 %v4063_v28 }
 0x451   :  { %4065 = vmatprep.subr.bf16.mxu1 %v4222_v0 }
 0x454   :  { %4067 = vmatpush3.bf16.msra.mxu1 %v4066_v38 }
 0x455   :  { %4068 = vmatprep.subr.bf16.mxu1 %v4222_v0 }
 0x458   :  { %4070 = vmatpush3.bf16.msra.mxu1 %v4069_v25 }
 0x459   :  { %4071 = vmatprep.subr.bf16.mxu1 %v4222_v0 }
 0x45c   :  { %4073 = vmatpush3.bf16.msra.mxu1 %v4072_v37 }
 0x45d   :  { %4074 = vmatprep.subr.bf16.mxu1 %v4222_v0 }
 0x460   :  { %4076 = vmatpush3.bf16.msra.mxu1 %v4075_v9 }
 0x461   :  { %4077 = vmatprep.subr.bf16.mxu1 %v4222_v0 }
 0x463   :  { %3527 = vmatmul.mubr.f32.vlgmr.msra.gmra.mrb[2].mxu1 %v5152_v35 }
 0x464   :  { %4079 = vmatpush3.bf16.msra.mxu1 %v4078_v24  ;;  %3561 = vmatprep.mubr.msk.f32.mxu1 %vm4223_vm0, %v4224_v4 }
 0x465   :  { %4080 = vmatprep.subr.bf16.mxu1 %v4222_v0 }
 0x468   :  { %4082 = vmatpush3.bf16.msra.mxu1 %v4081_v41 }
 0x469   :  { %4083 = vmatprep.subr.bf16.mxu1 %v4222_v0 }
 0x46c   :  { %4085 = vmatpush3.bf16.msra.mxu1 %v4084_v63 }
 0x46d   :  { %4086 = vmatprep.subr.bf16.mxu1 %v4222_v0 }
 0x470   :  { %4088 = vmatpush3.bf16.msra.mxu1 %v4087_v47 }
 0x471   :  { %4089 = vmatprep.subr.bf16.mxu1 %v4222_v0 }
 0x474   :  { %4091 = vmatpush3.bf16.msra.mxu1 %v4090_v61 }
 0x475   :  { %4092 = vmatprep.subr.bf16.mxu1 %v4222_v0 }
 0x478   :  { %4094 = vmatpush3.bf16.msra.mxu1 %v4093_v5 }
 0x479   :  { %4095 = vmatprep.subr.bf16.mxu1 %v4222_v0 }
 0x47c   :  { %4097 = vmatpush3.bf16.msra.mxu1 %v4096_v18 }
 0x47d   :  { %4098 = vmatprep.subr.bf16.mxu1 %v4222_v0 }
 0x480   :  { %4100 = vmatpush3.bf16.msra.mxu1 %v4099_v50 }
 0x481   :  { %4101 = vmatprep.subr.bf16.mxu1 %v4222_v0 }
 0x483   :  { %3562 = vmatmul.mubr.f32.vlgmr.msra.gmra.mrb[2].mxu1 %v1997_v26 }
 0x484   :  { %4103 = vmatpush3.bf16.msra.mxu1 %v4883_v55  ;;  %3596 = vmatprep.mubr.msk.f32.mxu1 %vm4223_vm0, %v4224_v4 }
 0x485   :  { %4104 = vmatprep.subr.bf16.mxu1 %v4222_v0 }
 0x488   :  { %4106 = vmatpush3.bf16.msra.mxu1 %v4969_v7 }
 0x489   :  { %4107 = vmatprep.subr.bf16.mxu1 %v4222_v0 }
 0x48c   :  { %4109 = vmatpush3.bf16.msra.mxu1 %v4979_v46 }
 0x48d   :  { %4110 = vmatprep.subr.bf16.mxu1 %v4222_v0 }
 0x490   :  { %4112 = vmatpush3.bf16.msra.mxu1 %v4989_v59 }
 0x491   :  { %4113 = vmatprep.subr.bf16.mxu1 %v4222_v0 }
 0x494   :  { %4115 = vmatpush3.bf16.msra.mxu1 %v4999_v42 }
 0x495   :  { %4116 = vmatprep.subr.bf16.mxu1 %v4222_v0 }
 0x498   :  { %4118 = vmatpush3.bf16.msra.mxu1 %v5037_v12 }
 0x499   :  { %4119 = vmatprep.subr.bf16.mxu1 %v4222_v0 }
 0x49c   :  { %4121 = vmatpush3.bf16.msra.mxu1 %v5047_v43 }
 0x49d   :  { %4122 = vmatprep.subr.bf16.mxu1 %v4222_v0 }
 0x4a0   :  { %4124 = vmatpush3.bf16.msra.mxu1 %v5058_v40 }
 0x4a1   :  { %4125 = vmatprep.subr.bf16.mxu1 %v4222_v0 }
 0x4a3   :  { %3597 = vmatmul.mubr.f32.vlgmr.msra.gmra.mrb[2].mxu1 %v1998_v53 }
 0x4a4   :  { %4127 = vmatpush3.bf16.msra.mxu1 %v4126_v23  ;;  %3631 = vmatprep.mubr.msk.f32.mxu1 %vm4223_vm0, %v4224_v4 }
 0x4a5   :  { %4128 = vmatprep.subr.bf16.mxu1 %v4222_v0 }
 0x4a8   :  { %4130 = vmatpush3.bf16.msra.mxu1 %v4129_v52 }
 0x4a9   :  { %4131 = vmatprep.subr.bf16.mxu1 %v4222_v0 }
 0x4ac   :  { %4133 = vmatpush3.bf16.msra.mxu1 %v4132_v56 }
 0x4ad   :  { %4134 = vmatprep.subr.bf16.mxu1 %v4222_v0 }
 0x4b0   :  { %4136 = vmatpush3.bf16.msra.mxu1 %v4135_v3 }
 0x4b1   :  { %4137 = vmatprep.subr.bf16.mxu1 %v4222_v0 }
 0x4b4   :  { %4139 = vmatpush3.bf16.msra.mxu1 %v4138_v1 }
 0x4b5   :  { %4140 = vmatprep.subr.bf16.mxu1 %v4222_v0 }
 0x4b8   :  { %4142 = vmatpush3.bf16.msra.mxu1 %v4141_v27 }
 0x4b9   :  { %4143 = vmatprep.subr.bf16.mxu1 %v4222_v0 }
 0x4bc   :  { %4145 = vmatpush3.bf16.msra.mxu1 %v4144_v29 }
 0x4bd   :  { %4146 = vmatprep.subr.bf16.mxu1 %v4222_v0 }
 0x4c0   :  { %4148 = vmatpush3.bf16.msra.mxu1 %v4147_v30 }
 0x4c1   :  { %4149 = vmatprep.subr.bf16.mxu1 %v4222_v0 }
 0x4c3   :  { %3632 = vmatmul.mubr.f32.vlgmr.msra.gmra.mrb[2].mxu1 %v5152_v35 }
 0x4c4   :  { %4151 = vmatpush3.bf16.msra.mxu1 %v4883_v55  ;;  %3666 = vmatprep.mubr.msk.f32.mxu1 %vm4223_vm0, %v4224_v4  ;;  %v2564_v4 = vld [vmem:[%s5266_s4 + $0x3] ss:$0 sm:$0xff] }
 0x4c5   :  { %4152 = vmatprep.subr.bf16.mxu1 %v4222_v0 }
 0x4c8   :  { %4154 = vmatpush3.bf16.msra.mxu1 %v4969_v7 }
 0x4c9   :  { %4155 = vmatprep.subr.bf16.mxu1 %v4222_v0 }
 0x4cc   :  { %4157 = vmatpush3.bf16.msra.mxu1 %v4979_v46 }
 0x4cd   :  { %4158 = vmatprep.subr.bf16.mxu1 %v4222_v0 }
 0x4d0   :  { %4160 = vmatpush3.bf16.msra.mxu1 %v4989_v59 }
 0x4d1   :  { %4161 = vmatprep.subr.bf16.mxu1 %v4222_v0 }
 0x4d4   :  { %4163 = vmatpush3.bf16.msra.mxu1 %v4999_v42 }
 0x4d5   :  { %4164 = vmatprep.subr.bf16.mxu1 %v4222_v0 }
 0x4d8   :  { %4166 = vmatpush3.bf16.msra.mxu1 %v5037_v12 }
 0x4d9   :  { %4167 = vmatprep.subr.bf16.mxu1 %v4222_v0 }
 0x4dc   :  { %4169 = vmatpush3.bf16.msra.mxu1 %v5047_v43 }
 0x4dd   :  { %4170 = vmatprep.subr.bf16.mxu1 %v4222_v0 }
 0x4e0   :  { %4172 = vmatpush3.bf16.msra.mxu1 %v5058_v40 }
 0x4e3   :  { %3667 = vmatmul.mubr.f32.vlgmr.msra.gmra.mrb[2].mxu1 %v5152_v35 }
 0x5b6   :  { %v2552_v55 = vpop.f32.mrb[2].mxu1 }
 0x5b7   :  { %v4176_v7 = vadd.f32 %v2564_v4, %v2552_v55  ;;  %v3668_v46 = vpop.f32.mrb[3].mxu1 }
 0x5b9   :  { %2556 = vst [vmem:[%s5268_s5] sm:$0xf] %v4176_v7 }

</bundles_post_ra>
